<compile_context>
chip_gen: v5e
topology: v5e:2x2
jax: 0.10.0
libtpu: 0.0.40
codegen_flags: <defaults>
</compile_context>

<pallas_src>
import jax
import jax.numpy as jnp
from jax.experimental import pallas as pl
from jax.experimental.pallas import tpu as pltpu

IN_FEATURES = 1 * 28 * 28   # 784
HIDDEN = 20
OUT = 10

HIDDEN_PAD = 128            # lane-dense hidden width (zero-padded columns)
OUT_PAD = 128               # lane-dense output width (padded classes masked out)
NEG_LARGE = -1e30           # bias for padded logit columns -> exp() underflows to 0


def mlp_kernel(x_ref, w1_ref, b1_ref, w2_ref, b2_ref, out_ref):
    # x_ref : (TB, 784)  bf16      w1_ref: (784, 128) bf16   b1_ref: (1, 128) f32
    # w2_ref: (128, 128) bf16      b2_ref: (1, 128)  f32     out_ref: (TB, 128) f32
    x = x_ref[...]

    # layer 1: Linear(784, 20) + Tanh  (bf16 MXU matmul, f32 accumulate;
    # padded hidden columns: 0 weights + 0 bias -> tanh(0) = 0)
    h = jnp.dot(x, w1_ref[...], preferred_element_type=jnp.float32)
    h = jnp.tanh(h + b1_ref[...])

    # layer 2: Linear(20, 10)  (padded hidden rows of w2 are zero; padded logit
    # columns get bias -1e30 so they vanish from the softmax sum)
    logits = jnp.dot(h.astype(jnp.bfloat16), w2_ref[...],
                     preferred_element_type=jnp.float32) + b2_ref[...]

    # LogSoftmax over the feature axis (numerically stable max-shift), in f32.
    m = jnp.max(logits, axis=-1, keepdims=True)
    shifted = logits - m
    lse = jnp.log(jnp.sum(jnp.exp(shifted), axis=-1, keepdims=True))
    out_ref[...] = (shifted - lse).astype(out_ref.dtype)


def _pad_params(w1, b1, w2, b2):
    """Pad parameters to lane-dense 128-wide feature dims; weights -> bf16."""
    w1p = jnp.zeros((IN_FEATURES, HIDDEN_PAD), jnp.float32).at[:, :HIDDEN].set(w1)
    b1p = jnp.zeros((1, HIDDEN_PAD), jnp.float32).at[:, :HIDDEN].set(
        b1.reshape(1, HIDDEN))
    w2p = jnp.zeros((HIDDEN_PAD, OUT_PAD), jnp.float32).at[:HIDDEN, :OUT].set(w2)
    b2p = jnp.full((1, OUT_PAD), NEG_LARGE, jnp.float32).at[:, :OUT].set(
        b2.reshape(1, OUT))
    # Weights streamed/held in bf16 (MXU-native everywhere); biases stay f32.
    return (w1p.astype(jnp.bfloat16), b1p, w2p.astype(jnp.bfloat16), b2p)


def _round_up(n, m):
    return ((n + m - 1) // m) * m


def mlp_forward(x_nchw, w1, b1, w2, b2, *, tb=2048):
    """x_nchw: (B, 1, 28, 28) float -> (B, 10) f32 log-probabilities.

    tb: batch tile (rows per grid step).  Default 2048 bf16 rows ~= 3.1 MiB per
    x buffer (x2 for double buffering), comfortably inside every generation's
    scoped-VMEM default.  tb is clamped so that for B > tb the grid always has
    >= 2 steps (megacore / v7x TensorCore sharding via 'parallel').
    """
    B = x_nchw.shape[0]
    # x.view(-1, 784) (no-copy reshape) + bf16 cast for the streamed matmul input.
    x = x_nchw.reshape(B, IN_FEATURES).astype(jnp.bfloat16)

    # Batch tile: multiple of 8 sublanes; capped so large batches yield >= 2
    # grid steps (and tiny batches don't allocate an oversized tile).
    tb = max(8, (int(tb) // 8) * 8)
    tb = min(tb, max(8, _round_up(pl.cdiv(B, 2), 8)))
    grid = pl.cdiv(B, tb)   # ragged last block handled by Pallas (no jnp.pad copy)

    w1p, b1p, w2p, b2p = _pad_params(w1, b1, w2, b2)

    cost = pl.CostEstimate(
        flops=2 * B * IN_FEATURES * HIDDEN_PAD + 2 * B * HIDDEN_PAD * OUT_PAD,
        transcendentals=B * (HIDDEN_PAD + OUT_PAD),
        bytes_accessed=(2 * B * IN_FEATURES                     # bf16 x read
                        + 4 * B * OUT_PAD                       # f32 out write
                        + 2 * (IN_FEATURES * HIDDEN_PAD + HIDDEN_PAD * OUT_PAD)
                        + 4 * 2 * (HIDDEN_PAD + OUT_PAD)),
    )

    out_padded = pl.pallas_call(
        mlp_kernel,
        out_shape=jax.ShapeDtypeStruct((B, OUT_PAD), jnp.float32),
        grid_spec=pl.GridSpec(
            grid=(grid,),
            in_specs=[
                # streamed, double-buffered bf16 batch tile (K=784 kept unpadded)
                pl.BlockSpec((tb, IN_FEATURES), lambda i: (i, 0)),
                # weights/biases: constant index_map -> VMEM-resident across tiles
                pl.BlockSpec((IN_FEATURES, HIDDEN_PAD), lambda i: (0, 0)),
                pl.BlockSpec((1, HIDDEN_PAD), lambda i: (0, 0)),
                pl.BlockSpec((HIDDEN_PAD, OUT_PAD), lambda i: (0, 0)),
                pl.BlockSpec((1, OUT_PAD), lambda i: (0, 0)),
            ],
            out_specs=pl.BlockSpec((tb, OUT_PAD), lambda i: (i, 0)),
        ),
        compiler_params=pltpu.CompilerParams(
            dimension_semantics=("parallel",),
            # Headroom beyond the 16/32 MiB scoped defaults so tb up to ~4096
            # still compiles; well under the 64 MiB per-TC physical VMEM on v7x.
            vmem_limit_bytes=48 * 1024 * 1024,
        ),
        cost_estimate=cost,
    )(x, w1p, b1p, w2p, b2p)

    return out_padded[:, :OUT]


def init_params(key):
    """Deterministic init matching PyTorch nn.Linear shapes:
    U(-1/sqrt(fan_in), 1/sqrt(fan_in)) for weights and biases."""
    k1, k2, k3, k4 = jax.random.split(key, 4)
    bound1 = 1.0 / jnp.sqrt(jnp.float32(IN_FEATURES))
    bound2 = 1.0 / jnp.sqrt(jnp.float32(HIDDEN))
    # stored as (in, out) so the kernel does x @ W (PyTorch stores (out, in), does x @ W.T)
    w1 = jax.random.uniform(k1, (IN_FEATURES, HIDDEN), jnp.float32, -bound1, bound1)
    b1 = jax.random.uniform(k2, (HIDDEN,), jnp.float32, -bound1, bound1)
    w2 = jax.random.uniform(k3, (HIDDEN, OUT), jnp.float32, -bound2, bound2)
    b2 = jax.random.uniform(k4, (OUT,), jnp.float32, -bound2, bound2)
    return w1, b1, w2, b2


def _reference(x_nchw, w1, b1, w2, b2):
    """Pure-JAX f32 reference of the PyTorch forward."""
    x_flat = x_nchw.reshape(x_nchw.shape[0], IN_FEATURES).astype(jnp.float32)
    return jax.nn.log_softmax(jnp.tanh(x_flat @ w1 + b1) @ w2 + b2, axis=-1)


def _check(out, ref, name):
    assert out.shape == ref.shape, (name, out.shape, ref.shape)
    err = float(jnp.max(jnp.abs(out - ref)))
    # bf16 inputs/weights vs f32 reference: expect ~1e-3..1e-2 absolute error.
    assert jnp.allclose(out, ref, atol=3e-2, rtol=3e-2), (name, err)


if __name__ == "__main__":
    key = jax.random.PRNGKey(0)
    k_x, k_x2, k_x3, k_p = jax.random.split(key, 4)
    w1, b1, w2, b2 = init_params(k_p)

    # Small-batch check (single grid step).
    B = 8
    x = jax.random.normal(k_x, (B, 1, 28, 28), jnp.float32)   # NCHW like PyTorch MNIST
    out = mlp_forward(x, w1, b1, w2, b2)
    jax.block_until_ready(out)
    _check(out, _reference(x, w1, b1, w2, b2), "B=8")

    # Multi-tile, non-multiple-of-tb batch: 200 = 3*64 + 8 -> 4 grid steps with a
    # partial last block (no wrapper-side padding copy of x).
    B2 = 200
    x2 = jax.random.normal(k_x2, (B2, 1, 28, 28), jnp.float32)
    out2 = mlp_forward(x2, w1, b1, w2, b2, tb=64)
    jax.block_until_ready(out2)
    _check(out2, _reference(x2, w1, b1, w2, b2), "B=200")

    # Non-multiple-of-8 batch: exercises masked tail writes of the last block.
    B3 = 13
    x3 = jax.random.normal(k_x3, (B3, 1, 28, 28), jnp.float32)
    out3 = mlp_forward(x3, w1, b1, w2, b2)
    jax.block_until_ready(out3)
    _check(out3, _reference(x3, w1, b1, w2, b2), "B=13")

    print("KERNEL_OK")
</pallas_src>

<mosaic_0001>
module attributes {stable_mosaic.version = 11 : i64} {
  func.func @mlp_kernel(%arg0: i32, %arg1: memref<8x784xbf16, #tpu.memory_space<vmem>>, %arg2: memref<784x128xbf16, #tpu.memory_space<vmem>>, %arg3: memref<1x128xf32, #tpu.memory_space<vmem>>, %arg4: memref<128x128xbf16, #tpu.memory_space<vmem>>, %arg5: memref<1x128xf32, #tpu.memory_space<vmem>>, %arg6: memref<8x128xf32, #tpu.memory_space<vmem>>) attributes {dimension_semantics = [#tpu.dimension_semantics<parallel>], iteration_bounds = array<i64: 1>, scalar_prefetch = 0 : i64, scratch_operands = 0 : i64, tpu.core_type = #tpu.core_type<tc>, window_params = [{transform_indices = @transform_0, window_bounds = array<i64: 8, 784>}, {pipeline_mode = #tpu.pipeline_mode<synchronous>, transform_indices = @transform_1, window_bounds = array<i64: 784, 128>}, {pipeline_mode = #tpu.pipeline_mode<synchronous>, transform_indices = @transform_2, window_bounds = array<i64: 1, 128>}, {pipeline_mode = #tpu.pipeline_mode<synchronous>, transform_indices = @transform_3, window_bounds = array<i64: 128, 128>}, {pipeline_mode = #tpu.pipeline_mode<synchronous>, transform_indices = @transform_4, window_bounds = array<i64: 1, 128>}, {transform_indices = @transform_5, window_bounds = array<i64: 8, 128>}]} {
    %c0 = arith.constant 0 : index
    %c0_0 = arith.constant 0 : index
    %0 = vector.load %arg1[%c0, %c0_0] : memref<8x784xbf16, #tpu.memory_space<vmem>>, vector<8x784xbf16>
    %c0_1 = arith.constant 0 : index
    %c0_2 = arith.constant 0 : index
    %1 = vector.load %arg2[%c0_1, %c0_2] : memref<784x128xbf16, #tpu.memory_space<vmem>>, vector<784x128xbf16>
    %cst = arith.constant dense<0.000000e+00> : vector<8x128xf32>
    %2 = tpu.matmul %0, %1, %cst {dimension_numbers = #tpu.dot_dimension_numbers<[1], [0], [0], [1], [0, 0, 1, 1], [], []>} : vector<8x784xbf16>, vector<784x128xbf16>, vector<8x128xf32> -> vector<8x128xf32>
    %c0_3 = arith.constant 0 : index
    %c0_4 = arith.constant 0 : index
    %3 = vector.load %arg3[%c0_3, %c0_4] : memref<1x128xf32, #tpu.memory_space<vmem>>, vector<1x128xf32>
    %4 = vector.broadcast %3 : vector<1x128xf32> to vector<8x128xf32>
    %5 = arith.addf %2, %4 : vector<8x128xf32>
    %6 = math.tanh %5 : vector<8x128xf32>
    %7 = arith.truncf %6 : vector<8x128xf32> to vector<8x128xbf16>
    %c0_5 = arith.constant 0 : index
    %c0_6 = arith.constant 0 : index
    %8 = vector.load %arg4[%c0_5, %c0_6] : memref<128x128xbf16, #tpu.memory_space<vmem>>, vector<128x128xbf16>
    %cst_7 = arith.constant dense<0.000000e+00> : vector<8x128xf32>
    %9 = tpu.matmul %7, %8, %cst_7 {dimension_numbers = #tpu.dot_dimension_numbers<[1], [0], [0], [1], [0, 0, 1, 1], [], []>} : vector<8x128xbf16>, vector<128x128xbf16>, vector<8x128xf32> -> vector<8x128xf32>
    %c0_8 = arith.constant 0 : index
    %c0_9 = arith.constant 0 : index
    %10 = vector.load %arg5[%c0_8, %c0_9] : memref<1x128xf32, #tpu.memory_space<vmem>>, vector<1x128xf32>
    %11 = vector.broadcast %10 : vector<1x128xf32> to vector<8x128xf32>
    %12 = arith.addf %9, %11 : vector<8x128xf32>
    %cst_10 = arith.constant dense<0xFF800000> : vector<8xf32>
    %13 = vector.multi_reduction <maximumf>, %12, %cst_10 [1] : vector<8x128xf32> to vector<8xf32>
    %14 = vector.shape_cast %13 : vector<8xf32> to vector<8x1xf32>
    %15 = vector.broadcast %14 : vector<8x1xf32> to vector<8x128xf32>
    %16 = arith.subf %12, %15 : vector<8x128xf32>
    %17 = math.exp %16 : vector<8x128xf32>
    %cst_11 = arith.constant dense<0.000000e+00> : vector<8xf32>
    %18 = vector.multi_reduction <add>, %17, %cst_11 [1] : vector<8x128xf32> to vector<8xf32>
    %19 = vector.shape_cast %18 : vector<8xf32> to vector<8x1xf32>
    %20 = math.log %19 : vector<8x1xf32>
    %21 = vector.broadcast %20 : vector<8x1xf32> to vector<8x128xf32>
    %22 = arith.subf %16, %21 : vector<8x128xf32>
    %c0_12 = arith.constant 0 : index
    %c0_13 = arith.constant 0 : index
    %23 = vector.load %arg6[%c0_12, %c0_13] : memref<8x128xf32, #tpu.memory_space<vmem>>, vector<8x128xf32>
    tpu.vector_store %arg6[%c0_12, %c0_13], %22 {strides = array<i32>} : memref<8x128xf32, #tpu.memory_space<vmem>>, vector<8x128xf32>,
    return
  }
  func.func @transform_0(%arg0: i32) -> (i32, i32) {
    %c0_i32 = arith.constant 0 : i32
    %c0_i32_0 = arith.constant 0 : i32
    return %arg0, %c0_i32 : i32, i32
  }
  func.func @transform_1(%arg0: i32) -> (i32, i32) {
    %c0_i32 = arith.constant 0 : i32
    %c0_i32_0 = arith.constant 0 : i32
    %c0_i32_1 = arith.constant 0 : i32
    return %c0_i32, %c0_i32_0 : i32, i32
  }
  func.func @transform_2(%arg0: i32) -> (i32, i32) {
    %c0_i32 = arith.constant 0 : i32
    %c0_i32_0 = arith.constant 0 : i32
    %c0_i32_1 = arith.constant 0 : i32
    return %c0_i32, %c0_i32_0 : i32, i32
  }
  func.func @transform_3(%arg0: i32) -> (i32, i32) {
    %c0_i32 = arith.constant 0 : i32
    %c0_i32_0 = arith.constant 0 : i32
    %c0_i32_1 = arith.constant 0 : i32
    return %c0_i32, %c0_i32_0 : i32, i32
  }
  func.func @transform_4(%arg0: i32) -> (i32, i32) {
    %c0_i32 = arith.constant 0 : i32
    %c0_i32_0 = arith.constant 0 : i32
    %c0_i32_1 = arith.constant 0 : i32
    return %c0_i32, %c0_i32_0 : i32, i32
  }
  func.func @transform_5(%arg0: i32) -> (i32, i32) {
    %c0_i32 = arith.constant 0 : i32
    %c0_i32_0 = arith.constant 0 : i32
    return %arg0, %c0_i32 : i32, i32
  }
}

</mosaic_0001>

<bundles_post_ra>
// kernel: tpu_custom_call.1
= control target key start
LH: loop header
LB: loop body
LE: loop exit
PB: predicated region body
PF: predicated region fallthrough
CT: control target
= control target key end

     0   :  { %10 = vsyncpa [#allocation3], 0  ;;  %s1154_s0 = inlined_call_operand.hbm [shape: bf16[8,784], index: 0, kind: input, shape index: {}]   ;;  %s1155_s1 = inlined_call_operand.hbm [shape: bf16[784,128], index: 1, kind: input, shape index: {}]   ;;  %s1156_s2 = inlined_call_operand.vmem [shape: f32[1,128], index: 2, kind: input, shape index: {}]   ;;  %s1157_s3 = inlined_call_operand.hbm [shape: bf16[128,128], index: 3, kind: input, shape index: {}]   ;;  %s1158_s4 = inlined_call_operand.vmem [shape: f32[1,128], index: 4, kind: input, shape index: {}]   ;;  %s1159_s5 = inlined_call_operand.hbm [shape: f32[8,128], index: 5, kind: output, shape index: {}]  }
   0x1   :  { %11 = vsyncpa [#allocation6], 0  ;;  %s28_s20 = sshll.u32 %s1155_s1, 4  ;;  %s29_s20 = int_to_ptr.hbm [resolvable:$true] %s28_s20 }
   0x2   :  { %12 = vsyncpa [#allocation4], 0  ;;  %s1100_s21 = smov [#allocation5]   ;;  %s18_s25 = sshll.u32 %s1154_s0, 4  ;;  %s19_s25 = int_to_ptr.hbm [resolvable:$true] %s18_s25 }
   0x3   :  { %s30_s22 = sshll.u32 %s1100_s21, 4  ;;  %s1101_s26 = smov 64   ;;  %s31_s22 = int_to_ptr.vmem [resolvable:$true] %s30_s22 }
   0x4   :  { %s1102_s27 = smov 4   ;;  %s1103_s28 = smov [#allocation2]  }
   0x5   :  { %36 = dma.hbm_to_vmem [thread:$0]  %s29_s20, 6272, %s31_s22, [#allocation6], %s1101_s26, %s1101_s26, %s1102_s27  }
   0x6   :  { %s20_s29 = sshll.u32 %s1103_s28, 4  ;;  %s43_s7 = sshll.u32 %s1157_s3, 4  ;;  %s21_s29 = int_to_ptr.vmem [resolvable:$true] %s20_s29  ;;  %s44_s7 = int_to_ptr.hbm [resolvable:$true] %s43_s7 }
   0x7   :  { %23 = dma.hbm_to_vmem [thread:$0]  %s19_s25, 448, %s21_s29, [#allocation3]  }
   0x8   :  { %s1104_s1 = smov [#allocation7]  }
   0x9   :  { %s45_s8 = sshll.u32 %s1104_s1, 4  ;;  %s46_s8 = int_to_ptr.vmem [resolvable:$true] %s45_s8 }
   0xa   :  { %51 = dma.hbm_to_vmem [thread:$0]  %s44_s7, 1024, %s46_s8, [#allocation6], %s1101_s26, %s1101_s26, %s1102_s27  }
   0xb   :  { %1094 = dma.done.wait [#allocation3], 448  }
   0xc   :  { %1095 = vsyncadd [#allocation3], 4294966848 }
   0xd   :  { %1096 = dma.done.wait [#allocation6], 7296  }
   0xe   :  { %1097 = vsyncadd [#allocation6], 4294960000  ;;  %v934_v0 = vld [vmem:[#allocation5 + $0x38] sm:$0xff]  ;;  %v933_v3 = vld [vmem:[#allocation5 + $0x30] sm:$0xff]  ;;  %vm491_vm0 = vcmask 130048   ;;  %s1105_s10 = smov [#allocation8]  }
   0xf   :  { %v942_v1 = vld [vmem:[#allocation5 + $0x78] sm:$0xff]  ;;  %495 = vmatpush.bf16.msra.mxu0 %v934_v0  ;;  %v941_v4 = vld [vmem:[#allocation5 + $0x70] sm:$0xff]  ;;  %v932_v8 = vld [vmem:[#allocation5 + $0x28] sm:$0xff]  ;;  %s685_s11 = sshll.u32 %s1105_s10, 4  ;;  %s687_s14 = sshll.u32 %s1159_s5, 4  ;;  %s686_s11 = int_to_ptr.vmem [resolvable:$true] %s685_s11  ;;  %s688_s14 = int_to_ptr.hbm [resolvable:$true] %s687_s14 }
  0x10   :  { %v950_v2 = vld [vmem:[#allocation5 + $0xb8] sm:$0xff]  ;;  %508 = vmatpush.bf16.msra.mxu1 %v942_v1  ;;  %v949_v5 = vld [vmem:[#allocation5 + $0xb0] sm:$0xff]  ;;  %v940_v9 = vld [vmem:[#allocation5 + $0x68] sm:$0xff] }
  0x11   :  { %521 = vmatpush.bf16.msra.mxu2 %v950_v2  ;;  %v958_v6 = vld [vmem:[#allocation5 + $0xf8] sm:$0xff]  ;;  %v957_v7 = vld [vmem:[#allocation5 + $0xf0] sm:$0xff]  ;;  %v948_v10 = vld [vmem:[#allocation5 + $0xa8] sm:$0xff] }
  0x12   :  { %534 = vmatpush.bf16.msra.mxu3 %v958_v6  ;;  %v956_v11 = vld [vmem:[#allocation5 + $0xe8] sm:$0xff]  ;;  %v931_v12 = vld [vmem:[#allocation5 + $0x20] sm:$0xff]  ;;  %v930_v16 = vld [vmem:[#allocation5 + $0x18] sm:$0xff] }
  0x13   :  { %496 = vmatpush.bf16.msra.mxu0 %v933_v3  ;;  %v939_v13 = vld [vmem:[#allocation5 + $0x60] sm:$0xff]  ;;  %v938_v17 = vld [vmem:[#allocation5 + $0x58] sm:$0xff]  ;;  %v929_v20 = vld [vmem:[#allocation5 + $0x10] sm:$0xff] }
  0x14   :  { %509 = vmatpush.bf16.msra.mxu1 %v941_v4  ;;  %v947_v14 = vld [vmem:[#allocation5 + $0xa0] sm:$0xff]  ;;  %v946_v18 = vld [vmem:[#allocation5 + $0x98] sm:$0xff]  ;;  %v937_v21 = vld [vmem:[#allocation5 + $0x50] sm:$0xff] }
  0x15   :  { %522 = vmatpush.bf16.msra.mxu2 %v949_v5  ;;  %v955_v15 = vld [vmem:[#allocation5 + $0xe0] sm:$0xff]  ;;  %v954_v19 = vld [vmem:[#allocation5 + $0xd8] sm:$0xff]  ;;  %v945_v22 = vld [vmem:[#allocation5 + $0x90] sm:$0xff] }
  0x16   :  { %535 = vmatpush.bf16.msra.mxu3 %v957_v7  ;;  %v953_v23 = vld [vmem:[#allocation5 + $0xd0] sm:$0xff]  ;;  %v928_v24 = vld [vmem:[#allocation5 + $0x8] sm:$0xff]  ;;  %v927_v32 = vld [vmem:[#allocation5] sm:$0xff] }
  0x17   :  { %497 = vmatpush.bf16.msra.mxu0 %v932_v8  ;;  %v936_v25 = vld [vmem:[#allocation5 + $0x48] sm:$0xff]  ;;  %v935_v33 = vld [vmem:[#allocation5 + $0x40] sm:$0xff]  ;;  %v966_v34 = vld [vmem:[#allocation5 + $0x138] sm:$0xff] }
  0x18   :  { %510 = vmatpush.bf16.msra.mxu1 %v940_v9  ;;  %v67_v26 = vld [vmem:[#allocation2] sm:$0xff]  ;;  %v68_v28 = vld [vmem:[#allocation2 + $0x8] sm:$0xff]  ;;  %v974_v35 = vld [vmem:[#allocation5 + $0x178] sm:$0xff] }
  0x19   :  { %523 = vmatpush.bf16.msra.mxu2 %v948_v10  ;;  %v944_v27 = vld [vmem:[#allocation5 + $0x88] sm:$0xff]  ;;  %v177_v29 = vunpack.c.l.b16 %v67_v26  ;;  %v178_v31 = vunpack.c.h.b16 %v67_v26  ;;  %v943_v36 = vld [vmem:[#allocation5 + $0x80] sm:$0xff]  ;;  %v179_v37 = vunpack.c.l.b16 %v68_v28  ;;  %v180_v40 = vunpack.c.h.b16 %v68_v28  ;;  %v965_v43 = vld [vmem:[#allocation5 + $0x130] sm:$0xff] }
  0x1a   :  { %536 = vmatpush.bf16.msra.mxu3 %v956_v11  ;;  %v952_v30 = vld [vmem:[#allocation5 + $0xc8] sm:$0xff]  ;;  %v951_v41 = vld [vmem:[#allocation5 + $0xc0] sm:$0xff]  ;;  %v973_v44 = vld [vmem:[#allocation5 + $0x170] sm:$0xff] }
  0x1b   :  { %498 = vmatpush.bf16.msra.mxu0 %v931_v12  ;;  %v184_v38 = vpack.c.b16 %v177_v29, %v177_v29  ;;  %v185_v39 = vpack.c.b16 %v178_v31, %v178_v31  ;;  %v975_v42 = vld [vmem:[#allocation5 + $0x180] sm:$0xff]  ;;  %v186_v45 = vpack.c.b16 %v179_v37, %v179_v37  ;;  %v187_v46 = vpack.c.b16 %v180_v40, %v180_v40  ;;  %v964_v47 = vld [vmem:[#allocation5 + $0x128] sm:$0xff]  ;;  %v70_v51 = vld [vmem:[#allocation2 + $0x18] sm:$0xf] }
  0x1c   :  { %511 = vmatpush.bf16.msra.mxu1 %v939_v13  ;;  %v972_v48 = vld [vmem:[#allocation5 + $0x168] sm:$0xff]  ;;  %v963_v49 = vld [vmem:[#allocation5 + $0x120] sm:$0xff]  ;;  %v962_v52 = vld [vmem:[#allocation5 + $0x118] sm:$0xff]  ;;  %v183_v54 = vunpack.c.l.b16 %v70_v51 }
  0x1d   :  { %524 = vmatpush.bf16.msra.mxu2 %v947_v14  ;;  %v971_v50 = vld [vmem:[#allocation5 + $0x160] sm:$0xff]  ;;  %v970_v53 = vld [vmem:[#allocation5 + $0x158] sm:$0xff]  ;;  %v961_v55 = vld [vmem:[#allocation5 + $0x110] sm:$0xff] }
  0x1e   :  { %537 = vmatpush.bf16.msra.mxu3 %v955_v15  ;;  %v969_v56 = vld [vmem:[#allocation5 + $0x150] sm:$0xff]  ;;  %v190_v57 = vpack.c.b16 %v183_v54, %v183_v54  ;;  %v960_v58 = vld [vmem:[#allocation5 + $0x108] sm:$0xff]  ;;  %v959_v63 = vld [vmem:[#allocation5 + $0x100] sm:$0xff] }
  0x1f   :  { %499 = vmatpush.bf16.msra.mxu0 %v930_v16  ;;  %v968_v59 = vld [vmem:[#allocation5 + $0x148] sm:$0xff]  ;;  %v69_v60 = vld [vmem:[#allocation2 + $0x10] sm:$0xff]  ;;  %v967_v0 = vld [vmem:[#allocation5 + $0x140] sm:$0xff] }
  0x20   :  { %512 = vmatpush.bf16.msra.mxu1 %v938_v17  ;;  %v181_v61 = vunpack.c.l.b16 %v69_v60  ;;  %v182_v62 = vunpack.c.h.b16 %v69_v60  ;;  %v983_v3 = vld [vmem:[#allocation7 + $0x38] sm:$0xff]  ;;  %v982_v4 = vld [vmem:[#allocation7 + $0x30] sm:$0xff]  ;;  %v981_v5 = vld [vmem:[#allocation7 + $0x28] sm:$0xff] }
  0x21   :  { %525 = vmatpush.bf16.msra.mxu2 %v946_v18  ;;  %v980_v6 = vld [vmem:[#allocation7 + $0x20] sm:$0xff]  ;;  %v979_v7 = vld [vmem:[#allocation7 + $0x18] sm:$0xff]  ;;  %v978_v10 = vld [vmem:[#allocation7 + $0x10] sm:$0xff] }
  0x22   :  { %538 = vmatpush.bf16.msra.mxu3 %v954_v19  ;;  %v188_v1 = vpack.c.b16 %v181_v61, %v181_v61  ;;  %v189_v2 = vpack.c.b16 %v182_v62, %v182_v62  ;;  %v977_v11 = vld [vmem:[#allocation7 + $0x8] sm:$0xff]  ;;  %v976_v12 = vld [vmem:[#allocation7] sm:$0xff]  ;;  %v990_v17 = vld [vmem:[%s1156_s2] ss:$0 sm:$0xff] }
  0x23   :  { %500 = vmatpush.bf16.msra.mxu0 %v929_v20 }
  0x24   :  { %513 = vmatpush.bf16.msra.mxu1 %v937_v21 }
  0x25   :  { %526 = vmatpush.bf16.msra.mxu2 %v945_v22 }
  0x26   :  { %539 = vmatpush.bf16.msra.mxu3 %v953_v23 }
  0x27   :  { %501 = vmatpush.bf16.msra.mxu0 %v928_v24 }
  0x28   :  { %514 = vmatpush.bf16.msra.mxu1 %v936_v25 }
  0x29   :  { %527 = vmatpush.bf16.msra.mxu2 %v944_v27 }
  0x2a   :  { %540 = vmatpush.bf16.msra.mxu3 %v952_v30 }
  0x2b   :  { %502 = vmatpush.bf16.msra.mxu0 %v927_v32 }
  0x2c   :  { %515 = vmatpush.bf16.msra.mxu1 %v935_v33 }
  0x2d   :  { %528 = vmatpush.bf16.msra.mxu2 %v943_v36 }
  0x2e   :  { %503 = vmatmul.bf16.vlgmr.msra.gmra.mxu0 %v184_v38  ;;  %541 = vmatpush.bf16.msra.mxu3 %v951_v41 }
  0x2f   :  { %547 = vmatpush.bf16.msrb.mxu0 %v966_v34  ;;  %516 = vmatmul.bf16.vlgmr.msra.gmra.mxu1 %v185_v39 }
  0x30   :  { %560 = vmatpush.bf16.msrb.mxu1 %v974_v35  ;;  %529 = vmatmul.bf16.vlgmr.msra.gmra.mxu2 %v186_v45  ;;  %v991_v35 = vld [vmem:[%s1158_s4] ss:$0 sm:$0xff] }
  0x31   :  { %580 = vmatpush.bf16.msrb.mxu2 %v975_v42  ;;  %542 = vmatmul.bf16.vlgmr.msra.gmra.mxu3 %v187_v46 }
  0x32   :  { %656 = vmatpush.bf16.msrb.mxu3 %v983_v3 }
  0x33   :  { %548 = vmatpush.bf16.msrb.mxu0 %v965_v43 }
  0x34   :  { %561 = vmatpush.bf16.msrb.mxu1 %v973_v44 }
  0x36   :  { %657 = vmatpush.bf16.msrb.mxu3 %v982_v4 }
  0x37   :  { %549 = vmatpush.bf16.msrb.mxu0 %v964_v47 }
  0x38   :  { %562 = vmatpush.bf16.msrb.mxu1 %v972_v48 }
  0x3a   :  { %658 = vmatpush.bf16.msrb.mxu3 %v981_v5 }
  0x3b   :  { %550 = vmatpush.bf16.msrb.mxu0 %v963_v49 }
  0x3c   :  { %563 = vmatpush.bf16.msrb.mxu1 %v971_v50 }
  0x3e   :  { %659 = vmatpush.bf16.msrb.mxu3 %v980_v6 }
  0x3f   :  { %551 = vmatpush.bf16.msrb.mxu0 %v962_v52 }
  0x40   :  { %564 = vmatpush.bf16.msrb.mxu1 %v970_v53  ;;  %894 = vmatmul.msk.bf16.vlgmr.msrb.gmra.mxu2 %vm491_vm0, %v190_v57 }
  0x42   :  { %660 = vmatpush.bf16.msrb.mxu3 %v979_v7 }
  0x43   :  { %552 = vmatpush.bf16.msrb.mxu0 %v961_v55 }
  0x44   :  { %565 = vmatpush.bf16.msrb.mxu1 %v969_v56 }
  0x46   :  { %661 = vmatpush.bf16.msrb.mxu3 %v978_v10 }
  0x47   :  { %553 = vmatpush.bf16.msrb.mxu0 %v960_v58 }
  0x48   :  { %566 = vmatpush.bf16.msrb.mxu1 %v968_v59 }
  0x4a   :  { %662 = vmatpush.bf16.msrb.mxu3 %v977_v11 }
  0x4b   :  { %554 = vmatpush.bf16.msrb.mxu0 %v959_v63 }
  0x4c   :  { %567 = vmatpush.bf16.msrb.mxu1 %v967_v0 }
  0x4e   :  { %555 = vmatmul.bf16.vlgmr.msrb.gmra.mxu0 %v188_v1  ;;  %663 = vmatpush.bf16.msrb.mxu3 %v976_v12 }
  0x4f   :  { %568 = vmatmul.bf16.vlgmr.msrb.gmra.mxu1 %v189_v2 }
  0xab   :  { %v504_v8 = vpop.f32.mrf.mxu0 }
  0xac   :  { %v517_v9 = vpop.f32.mrf.mxu1  ;;  %v505_v18 = vadd.f32 %v990_v17, %v504_v8 }
  0xae   :  { %v518_v21 = vadd.f32 %v517_v9, %v505_v18 }
  0xb3   :  { %v506_v13 = vpop.f32.mrf.mxu0  ;;  %v530_v15 = vpop.f32.mrf.mxu2 }
  0xb4   :  { %v519_v14 = vpop.f32.mrf.mxu1  ;;  %v543_v16 = vpop.f32.mrf.mxu3  ;;  %v531_v22 = vadd.f32 %v530_v15, %v518_v21 }
  0xb6   :  { %v544_v24 = vadd.f32 %v543_v16, %v531_v22 }
  0xbb   :  { %v532_v19 = vpop.f32.mrf.mxu2 }
  0xbc   :  { %v545_v20 = vpop.f32.mrf.mxu3 }
  0xc3   :  { %v582_v23 = vpop.f32.mrf.mxu2 }
  0xcb   :  { %v556_v25 = vpop.f32.mrf.mxu0  ;;  %v584_v29 = vpop.f32.mrf.mxu2 }
  0xcc   :  { %v569_v26 = vpop.f32.mrf.mxu1  ;;  %v557_v27 = vadd.f32 %v556_v25, %v544_v24 }
  0xce   :  { %v570_v28 = vadd.f32 %v569_v26, %v557_v27 }
  0xd0   :  { %v583_v30 = vadd.f32 %v582_v23, %v570_v28 }
  0xd2   :  { %992 = vtanh.f32 %v583_v30 }
  0xd3   :  { %v558_v31 = vpop.f32.mrf.mxu0 }
  0xd4   :  { %v571_v32 = vpop.f32.mrf.mxu1 }
  0xd8   :  { %v993_v33 = vpop.eup %992 }
  0xd9   :  { %v587_v34 = vpack.c.bf16 %v993_v33, %v993_v33 }
  0xdb   :  { %664 = vmatmul.bf16.vlgmr.msrb.gmra.mxu3 %v587_v34 }
 0x15e   :  { %v665_v36 = vpop.f32.mrf.mxu3 }
 0x15f   :  { %v666_v37 = vadd.f32 %v991_v35, %v665_v36 }
 0x161   :  { %669 = vmax.xlane.f32.xlu0 %v666_v37 }
 0x166   :  { %v667_v38 = vpop.f32.mrf.mxu3 }
 0x1d4   :  { %v670_v39 = vpop.xlane.xlu0 %669 }
 0x1d5   :  { %v671_v40 = vsub.f32 %v666_v37, %v670_v39 }
 0x1d7   :  { %v672_v41 = vmul.f32 1.442695, %v671_v40 }
 0x1d9   :  { %994 = vpow2.f32 %v672_v41 }
 0x1df   :  { %v995_v42 = vpop.eup %994 }
 0x1e0   :  { %674 = vadd.xlane.f32.xlu0 %v995_v42 }
 0x253   :  { %v675_v43 = vpop.xlane.xlu0 %674 }
 0x254   :  { %996 = vlog2.f32 %v675_v43 }
 0x25a   :  { %v997_v44 = vpop.eup %996 }
 0x25b   :  { %v677_v45 = vmul.f32 0.6931472, %v997_v44 }
 0x25d   :  { %v678_v46 = vsub.f32 %v671_v40, %v677_v45 }
 0x25f   :  { %679 = vst [vmem:[#allocation8] sm:$0xff] %v678_v46 }
 0x260   :  { %690 = dma.vmem_to_hbm [thread:$0]  %s686_s11, 128, %s688_s14, [#allocation4]  }
 0x261   :  { %1098 = dma.done.wait [#allocation4], 128  }
 0x262   :  { %1099 = vsyncadd [#allocation4], 4294967168 }
 0x263   :  { %695 = vsyncpa [#allocation3], 1 }
 0x264   :  { %696 = vsyncpa [#allocation6], 1 }
 0x265   :  { %697 = vsyncpa [#allocation4], 1 }

</bundles_post_ra>
